<compile_context>
chip_gen: v7x
topology: tpu7x:2x2x1
jax: 0.10.0
libtpu: 0.0.40
codegen_flags: <defaults>
</compile_context>

<pallas_src>
import numpy as np
import jax
import jax.numpy as jnp
from jax.experimental import pallas as pl
from jax.experimental.pallas import tpu as pltpu

# ----------------------------- configuration --------------------------------
B = 2
L = 64                        # tokens per batch element
IN_FEATURES = 32              # C
HIDDEN = 4 * IN_FEATURES      # 128 (mlp_ratio = 4.0)
TOKENS = B * L                # 128


# ------------------------------ kernel math ----------------------------------
def _gelu_tanh(x):
    # tanh-form GELU: the transcendental runs on the EUP slot instead of
    # ~10 VALU mul/adds; |err| vs exact erf-GELU < ~4e-4 (< 2e-3 tolerance).
    c = 0.7978845608028654  # sqrt(2/pi)
    return 0.5 * x * (1.0 + jnp.tanh(c * (x + 0.044715 * x * x * x)))


def _mlp_kernel(x_ref, w1_ref, b1_ref, w2_ref, b2_ref, o_ref):
    # Single invocation over the whole token slab: x_ref is (TOKENS, C).
    x = x_ref[...]
    h = jnp.dot(x, w1_ref[...], preferred_element_type=jnp.float32) + b1_ref[...]
    h = _gelu_tanh(h)                                            # (TOKENS, HIDDEN)
    y = jnp.dot(h, w2_ref[...], preferred_element_type=jnp.float32) + b2_ref[...]
    o_ref[...] = y                                               # (TOKENS, C)


# ------------------------------ pallas wrapper --------------------------------
def mlp_forward(x, w1, b1, w2, b2):
    """x: (B, L, C) float32 -> (B, L, C) float32 (fc1 -> GELU -> fc2, eval)."""
    xt = x.reshape(TOKENS, IN_FEATURES)          # pure row-major HBM reshape

    # Advisory cost hint so XLA schedules/overlaps this tiny custom call well.
    f32 = 4
    cost = pl.CostEstimate(
        flops=4 * TOKENS * IN_FEATURES * HIDDEN,           # two matmuls
        transcendentals=TOKENS * HIDDEN,                    # tanh in GELU
        bytes_accessed=f32 * (TOKENS * IN_FEATURES          # x in
                              + IN_FEATURES * HIDDEN + HIDDEN      # w1, b1
                              + HIDDEN * IN_FEATURES + IN_FEATURES # w2, b2
                              + TOKENS * IN_FEATURES),      # out
    )

    out = pl.pallas_call(
        _mlp_kernel,
        out_shape=jax.ShapeDtypeStruct((TOKENS, IN_FEATURES), jnp.float32),
        # No grid: one invocation, whole-array VMEM blocks for every operand.
        in_specs=[
            pl.BlockSpec((TOKENS, IN_FEATURES), lambda: (0, 0)),
            pl.BlockSpec((IN_FEATURES, HIDDEN), lambda: (0, 0)),
            pl.BlockSpec((1, HIDDEN), lambda: (0, 0)),
            pl.BlockSpec((HIDDEN, IN_FEATURES), lambda: (0, 0)),
            pl.BlockSpec((1, IN_FEATURES), lambda: (0, 0)),
        ],
        out_specs=pl.BlockSpec((TOKENS, IN_FEATURES), lambda: (0, 0)),
        cost_estimate=cost,
    )(xt, w1, b1, w2, b2)
    return out.reshape(B, L, IN_FEATURES)


# --------------------------- pure-JAX reference ------------------------------
def reference_forward(x, w1, b1, w2, b2):
    # nn.Linear -> nn.GELU() (exact erf) -> nn.Linear; dropout is identity.
    h = jax.nn.gelu(x @ w1 + b1[0], approximate=False)
    return h @ w2 + b2[0]


# ---------------------------------- main -------------------------------------
if __name__ == "__main__":
    key = jax.random.PRNGKey(0)
    k1, k2, k3, k4, k5 = jax.random.split(key, 5)

    # synthetic deterministic parameters ((in, out) layout)
    w1 = jax.random.normal(k1, (IN_FEATURES, HIDDEN), jnp.float32) * 0.05
    b1 = jax.random.normal(k2, (1, HIDDEN), jnp.float32) * 0.02
    w2 = jax.random.normal(k3, (HIDDEN, IN_FEATURES), jnp.float32) * 0.05
    b2 = jax.random.normal(k4, (1, IN_FEATURES), jnp.float32) * 0.02
    x = jax.random.normal(k5, (B, L, IN_FEATURES), jnp.float32)

    out = mlp_forward(x, w1, b1, w2, b2)
    out = jax.block_until_ready(out)

    ref = reference_forward(x, w1, b1, w2, b2)
    np.testing.assert_allclose(np.asarray(out), np.asarray(ref),
                               rtol=2e-3, atol=2e-3)
    print("KERNEL_OK")
</pallas_src>

<mosaic_0001>
module attributes {stable_mosaic.version = 11 : i64} {
  func.func @_mlp_kernel(%arg0: memref<128x32xf32, #tpu.memory_space<vmem>>, %arg1: memref<32x128xf32, #tpu.memory_space<vmem>>, %arg2: memref<1x128xf32, #tpu.memory_space<vmem>>, %arg3: memref<128x32xf32, #tpu.memory_space<vmem>>, %arg4: memref<1x32xf32, #tpu.memory_space<vmem>>, %arg5: memref<128x32xf32, #tpu.memory_space<vmem>>) attributes {dimension_semantics = [], scalar_prefetch = 0 : i64, scratch_operands = 0 : i64, tpu.core_type = #tpu.core_type<tc>} {
    %c0 = arith.constant 0 : index
    %c0_0 = arith.constant 0 : index
    %0 = vector.load %arg0[%c0, %c0_0] : memref<128x32xf32, #tpu.memory_space<vmem>>, vector<128x32xf32>
    %c0_1 = arith.constant 0 : index
    %c0_2 = arith.constant 0 : index
    %1 = vector.load %arg1[%c0_1, %c0_2] : memref<32x128xf32, #tpu.memory_space<vmem>>, vector<32x128xf32>
    %cst = arith.constant dense<0.000000e+00> : vector<128x128xf32>
    %2 = tpu.matmul %0, %1, %cst {dimension_numbers = #tpu.dot_dimension_numbers<[1], [0], [0], [1], [0, 0, 1, 1], [], []>} : vector<128x32xf32>, vector<32x128xf32>, vector<128x128xf32> -> vector<128x128xf32>
    %c0_3 = arith.constant 0 : index
    %c0_4 = arith.constant 0 : index
    %3 = vector.load %arg2[%c0_3, %c0_4] : memref<1x128xf32, #tpu.memory_space<vmem>>, vector<1x128xf32>
    %4 = vector.broadcast %3 : vector<1x128xf32> to vector<128x128xf32>
    %5 = arith.addf %2, %4 : vector<128x128xf32>
    %cst_5 = arith.constant 5.000000e-01 : f32
    %6 = vector.broadcast %cst_5 : f32 to vector<128x128xf32>
    %7 = arith.mulf %6, %5 : vector<128x128xf32>
    %cst_6 = arith.constant 4.471500e-02 : f32
    %8 = vector.broadcast %cst_6 : f32 to vector<128x128xf32>
    %9 = arith.mulf %8, %5 : vector<128x128xf32>
    %10 = arith.mulf %9, %5 : vector<128x128xf32>
    %11 = arith.mulf %10, %5 : vector<128x128xf32>
    %12 = arith.addf %5, %11 : vector<128x128xf32>
    %cst_7 = arith.constant 0.797884583 : f32
    %13 = vector.broadcast %cst_7 : f32 to vector<128x128xf32>
    %14 = arith.mulf %13, %12 : vector<128x128xf32>
    %15 = math.tanh %14 : vector<128x128xf32>
    %cst_8 = arith.constant 1.000000e+00 : f32
    %16 = vector.broadcast %cst_8 : f32 to vector<128x128xf32>
    %17 = arith.addf %16, %15 : vector<128x128xf32>
    %18 = arith.mulf %7, %17 : vector<128x128xf32>
    %c0_9 = arith.constant 0 : index
    %c0_10 = arith.constant 0 : index
    %19 = vector.load %arg3[%c0_9, %c0_10] : memref<128x32xf32, #tpu.memory_space<vmem>>, vector<128x32xf32>
    %cst_11 = arith.constant dense<0.000000e+00> : vector<128x32xf32>
    %20 = tpu.matmul %18, %19, %cst_11 {dimension_numbers = #tpu.dot_dimension_numbers<[1], [0], [0], [1], [0, 0, 1, 1], [], []>} : vector<128x128xf32>, vector<128x32xf32>, vector<128x32xf32> -> vector<128x32xf32>
    %c0_12 = arith.constant 0 : index
    %c0_13 = arith.constant 0 : index
    %21 = vector.load %arg4[%c0_12, %c0_13] : memref<1x32xf32, #tpu.memory_space<vmem>>, vector<1x32xf32>
    %22 = vector.broadcast %21 : vector<1x32xf32> to vector<128x32xf32>
    %23 = arith.addf %20, %22 : vector<128x32xf32>
    %c0_14 = arith.constant 0 : index
    %c0_15 = arith.constant 0 : index
    %24 = vector.load %arg5[%c0_14, %c0_15] : memref<128x32xf32, #tpu.memory_space<vmem>>, vector<128x32xf32>
    tpu.vector_store %arg5[%c0_14, %c0_15], %23 {strides = array<i32>} : memref<128x32xf32, #tpu.memory_space<vmem>>, vector<128x32xf32>,
    return
  }
}

</mosaic_0001>

<bundles_post_ra>
// kernel: tpu_custom_call.1
= control target key start
LH: loop header
LB: loop body
LE: loop exit
PB: predicated region body
PF: predicated region fallthrough
CT: control target
= control target key end

     0   :  { %vm47_vm0 = vcmask 261120   ;;  %s1159_s1 = inlined_call_operand.vmem [shape: f32[32,128], index: 1, kind: input, shape index: {}]   ;;  %s1160_s0 = inlined_call_operand.vmem [shape: f32[128,32], index: 0, kind: input, shape index: {}]   ;;  %s1161_s3 = inlined_call_operand.vmem [shape: f32[128,32], index: 3, kind: input, shape index: {}]   ;;  %s1162_s2 = inlined_call_operand.vmem [shape: f32[1,128], index: 2, kind: input, shape index: {}]   ;;  %s1163_s4 = inlined_call_operand.vmem [shape: f32[1,32], index: 4, kind: input, shape index: {}]   ;;  %s1164_s5 = inlined_call_operand.vmem [shape: f32[128,32], index: 5, kind: output, shape index: {}]  }
   0x1   :  { %v36_v0 = vld [vmem:[%s1159_s1] sm:$0xff]  ;;  %v37_v1 = vld [vmem:[%s1159_s1 + $0x8] sm:$0xff]  ;;  %v38_v2 = vld [vmem:[%s1159_s1 + $0x10] sm:$0xff] }
   0x2   :  { %v731_v3 = vpack.c.bf16 %v37_v1, %v36_v0  ;;  %v39_v4 = vld [vmem:[%s1159_s1 + $0x18] sm:$0xff]  ;;  %v20_v5 = vld [vmem:[%s1160_s0] sm:$0xff]  ;;  %v386_v8 = vld [vmem:[%s1161_s3 + $0x8] sm:$0xff] }
   0x3   :  { %v735_v6 = vpack.c.bf16 %v39_v4, %v38_v2  ;;  %651 = vmatprep.mubr.msk.f32.mxu0 %vm47_vm0, %v20_v5  ;;  %v385_v7 = vld [vmem:[%s1161_s3] sm:$0xff]  ;;  %v21_v9 = vld [vmem:[%s1160_s0 + $0x8] sm:$0xff]  ;;  %v22_v11 = vld [vmem:[%s1160_s0 + $0x10] sm:$0xff] }
   0x4   :  { %732 = vmatprep.subr.bf16.mxu0 %v731_v3  ;;  %v739_v10 = vpack.c.bf16 %v386_v8, %v385_v7  ;;  %v23_v12 = vld [vmem:[%s1160_s0 + $0x18] sm:$0xff]  ;;  %v24_v13 = vld [vmem:[%s1160_s0 + $0x20] sm:$0xff]  ;;  %v25_v14 = vld [vmem:[%s1160_s0 + $0x28] sm:$0xff] }
   0x5   :  { %734 = vmatpush3.bf16.msra.mxu0 %v731_v3  ;;  %v26_v15 = vld [vmem:[%s1160_s0 + $0x30] sm:$0xff]  ;;  %v27_v16 = vld [vmem:[%s1160_s0 + $0x38] sm:$0xff]  ;;  %v28_v17 = vld [vmem:[%s1160_s0 + $0x40] sm:$0xff] }
   0x6   :  { %736 = vmatprep.subr.bf16.mxu0 %v735_v6  ;;  %771 = vmatprep.subr.bf16.mxu1 %v739_v10  ;;  %v29_v18 = vld [vmem:[%s1160_s0 + $0x48] sm:$0xff]  ;;  %v30_v19 = vld [vmem:[%s1160_s0 + $0x50] sm:$0xff]  ;;  %v31_v20 = vld [vmem:[%s1160_s0 + $0x58] sm:$0xff] }
   0x7   :  { %779 = vmatpush3.bf16.msra.mxu1 %v739_v10  ;;  %v32_v21 = vld [vmem:[%s1160_s0 + $0x60] sm:$0xff]  ;;  %v33_v22 = vld [vmem:[%s1160_s0 + $0x68] sm:$0xff]  ;;  %v34_v23 = vld [vmem:[%s1160_s0 + $0x70] sm:$0xff] }
   0x8   :  { %v35_v24 = vld [vmem:[%s1160_s0 + $0x78] sm:$0xff]  ;;  %v387_v25 = vld [vmem:[%s1161_s3 + $0x10] sm:$0xff]  ;;  %v389_v28 = vld [vmem:[%s1161_s3 + $0x20] sm:$0xff] }
   0x9   :  { %738 = vmatpush3.bf16.msra.mxu0 %v735_v6  ;;  %v388_v26 = vld [vmem:[%s1161_s3 + $0x18] sm:$0xff]  ;;  %v390_v29 = vld [vmem:[%s1161_s3 + $0x28] sm:$0xff]  ;;  %v391_v31 = vld [vmem:[%s1161_s3 + $0x30] sm:$0xff] }
   0xa   :  { %740 = vmatprep.subr.bf16.mxu0 %v739_v10  ;;  %v743_v27 = vpack.c.bf16 %v388_v26, %v387_v25  ;;  %v747_v30 = vpack.c.bf16 %v390_v29, %v389_v28  ;;  %v392_v32 = vld [vmem:[%s1161_s3 + $0x38] sm:$0xff]  ;;  %v393_v34 = vld [vmem:[%s1161_s3 + $0x40] sm:$0xff]  ;;  %v394_v35 = vld [vmem:[%s1161_s3 + $0x48] sm:$0xff] }
   0xb   :  { %v751_v33 = vpack.c.bf16 %v392_v32, %v391_v31  ;;  %v755_v36 = vpack.c.bf16 %v394_v35, %v393_v34  ;;  %v395_v37 = vld [vmem:[%s1161_s3 + $0x50] sm:$0xff]  ;;  %v396_v38 = vld [vmem:[%s1161_s3 + $0x58] sm:$0xff]  ;;  %v397_v40 = vld [vmem:[%s1161_s3 + $0x60] sm:$0xff] }
   0xc   :  { %652 = vmatmul.mubr.msk.f32.vlgmr.msra.gmra.mrb[0].mxu0 %vm47_vm0, %v21_v9  ;;  %772 = vmatprep.subr.bf16.mxu1 %v743_v27  ;;  %v759_v39 = vpack.c.bf16 %v396_v38, %v395_v37  ;;  %v398_v41 = vld [vmem:[%s1161_s3 + $0x68] sm:$0xff]  ;;  %v399_v43 = vld [vmem:[%s1161_s3 + $0x70] sm:$0xff]  ;;  %v400_v44 = vld [vmem:[%s1161_s3 + $0x78] sm:$0xff] }
   0xd   :  { %654 = vmatprep.mubr.msk.f32.mxu0 %vm47_vm0, %v22_v11  ;;  %742 = vmatpush3.bf16.msra.mxu0 %v739_v10  ;;  %v763_v42 = vpack.c.bf16 %v398_v41, %v397_v40  ;;  %v767_v45 = vpack.c.bf16 %v400_v44, %v399_v43  ;;  %v976_v46 = vld [vmem:[%s1162_s2] ss:$0 sm:$0xff] }
   0xe   :  { %744 = vmatprep.subr.bf16.mxu0 %v743_v27  ;;  %780 = vmatpush3.bf16.msra.mxu1 %v743_v27 }
   0xf   :  { %773 = vmatprep.subr.bf16.mxu1 %v747_v30 }
  0x10   :  { %655 = vmatmul.mubr.msk.f32.gmra.mrb[2].mxu0 %vm47_vm0, %v23_v12 }
  0x11   :  { %657 = vmatprep.mubr.msk.f32.mxu0 %vm47_vm0, %v24_v13  ;;  %746 = vmatpush3.bf16.msra.mxu0 %v743_v27 }
  0x12   :  { %748 = vmatprep.subr.bf16.mxu0 %v747_v30  ;;  %781 = vmatpush3.bf16.msra.mxu1 %v747_v30 }
  0x13   :  { %774 = vmatprep.subr.bf16.mxu1 %v751_v33 }
  0x14   :  { %658 = vmatmul.mubr.msk.f32.gmra.mrb[4].mxu0 %vm47_vm0, %v25_v14 }
  0x15   :  { %660 = vmatprep.mubr.msk.f32.mxu0 %vm47_vm0, %v26_v15  ;;  %750 = vmatpush3.bf16.msra.mxu0 %v747_v30 }
  0x16   :  { %752 = vmatprep.subr.bf16.mxu0 %v751_v33  ;;  %782 = vmatpush3.bf16.msra.mxu1 %v751_v33 }
  0x17   :  { %775 = vmatprep.subr.bf16.mxu1 %v755_v36 }
  0x18   :  { %661 = vmatmul.mubr.msk.f32.gmra.mrb[6].mxu0 %vm47_vm0, %v27_v16 }
  0x19   :  { %663 = vmatprep.mubr.msk.f32.mxu0 %vm47_vm0, %v28_v17  ;;  %754 = vmatpush3.bf16.msra.mxu0 %v751_v33 }
  0x1a   :  { %756 = vmatprep.subr.bf16.mxu0 %v755_v36  ;;  %783 = vmatpush3.bf16.msra.mxu1 %v755_v36 }
  0x1b   :  { %776 = vmatprep.subr.bf16.mxu1 %v759_v39 }
  0x1c   :  { %664 = vmatmul.mubr.msk.f32.gmra.mrb[8].mxu0 %vm47_vm0, %v29_v18 }
  0x1d   :  { %666 = vmatprep.mubr.msk.f32.mxu0 %vm47_vm0, %v30_v19  ;;  %758 = vmatpush3.bf16.msra.mxu0 %v755_v36 }
  0x1e   :  { %760 = vmatprep.subr.bf16.mxu0 %v759_v39  ;;  %784 = vmatpush3.bf16.msra.mxu1 %v759_v39 }
  0x1f   :  { %777 = vmatprep.subr.bf16.mxu1 %v763_v42 }
  0x20   :  { %667 = vmatmul.mubr.msk.f32.gmra.mrb[10].mxu0 %vm47_vm0, %v31_v20 }
  0x21   :  { %669 = vmatprep.mubr.msk.f32.mxu0 %vm47_vm0, %v32_v21  ;;  %762 = vmatpush3.bf16.msra.mxu0 %v759_v39 }
  0x22   :  { %764 = vmatprep.subr.bf16.mxu0 %v763_v42  ;;  %785 = vmatpush3.bf16.msra.mxu1 %v763_v42 }
  0x23   :  { %778 = vmatprep.subr.bf16.mxu1 %v767_v45 }
  0x24   :  { %670 = vmatmul.mubr.msk.f32.gmra.mrb[12].mxu0 %vm47_vm0, %v33_v22 }
  0x25   :  { %672 = vmatprep.mubr.msk.f32.mxu0 %vm47_vm0, %v34_v23  ;;  %766 = vmatpush3.bf16.msra.mxu0 %v763_v42 }
  0x26   :  { %768 = vmatprep.subr.bf16.mxu0 %v767_v45  ;;  %786 = vmatpush3.bf16.msra.mxu1 %v767_v45 }
  0x28   :  { %673 = vmatmul.mubr.msk.f32.gmra.mrb[14].mxu0 %vm47_vm0, %v35_v24 }
  0x29   :  { %770 = vmatpush3.bf16.msra.mxu0 %v767_v45 }
  0xdf   :  { %v653_v47 = vpop.f32.mrb[0].mxu0 }
  0xe0   :  { %v168_v48 = vadd.f32 %v653_v47, %v976_v46  ;;  %v162_v49 = vpop.f32.mrb[1].mxu0 }
  0xe1   :  { %v163_v50 = vadd.f32 %v976_v46, %v162_v49 }
  0xe2   :  { %v258_v51 = vmul.f32 0.044715, %v168_v48  ;;  %v242_v35 = vmul.f32 0.5, %v168_v48 }
  0xe3   :  { %v257_v52 = vmul.f32 0.044715, %v163_v50  ;;  %v656_v53 = vpop.f32.mrb[2].mxu0  ;;  %v241_v41 = vmul.f32 0.5, %v163_v50 }
  0xe4   :  { %v274_v54 = vmul.f32 %v258_v51, %v168_v48  ;;  %v981_v55 = vadd.f32 %v656_v53, %v976_v46  ;;  %v172_v56 = vpop.f32.mrb[3].mxu0 }
  0xe5   :  { %v273_v57 = vmul.f32 %v257_v52, %v163_v50  ;;  %v984_v58 = vadd.f32 %v976_v46, %v172_v56 }
  0xe6   :  { %v290_v59 = vmul.f32 %v274_v54, %v168_v48  ;;  %v260_v60 = vmul.f32 0.044715, %v981_v55  ;;  %v244_v54 = vmul.f32 0.5, %v981_v55 }
  0xe7   :  { %v259_v61 = vmul.f32 0.044715, %v984_v58  ;;  %v659_v62 = vpop.f32.mrb[4].mxu0  ;;  %v289_v63 = vmul.f32 %v273_v57, %v163_v50 }
  0xe8   :  { %v306_v0 = vadd.f32 %v290_v59, %v168_v48  ;;  %v276_v1 = vmul.f32 %v260_v60, %v981_v55  ;;  %v990_v2 = vadd.f32 %v659_v62, %v976_v46  ;;  %v182_v3 = vpop.f32.mrb[5].mxu0 }
  0xe9   :  { %v275_v4 = vmul.f32 %v259_v61, %v984_v58  ;;  %v994_v5 = vadd.f32 %v976_v46, %v182_v3  ;;  %v305_v6 = vadd.f32 %v289_v63, %v163_v50 }
  0xea   :  { %v322_v7 = vmul.f32 0.7978846, %v306_v0  ;;  %v262_v8 = vmul.f32 0.044715, %v990_v2  ;;  %v292_v9 = vmul.f32 %v276_v1, %v981_v55 }
  0xeb   :  { %v261_v10 = vmul.f32 0.044715, %v994_v5  ;;  %v662_v11 = vpop.f32.mrb[6].mxu0  ;;  %v321_v12 = vmul.f32 0.7978846, %v305_v6  ;;  %v291_v13 = vmul.f32 %v275_v4, %v984_v58  ;;  %v243_v6 = vmul.f32 0.5, %v984_v58 }
  0xec   :  { %787 = vtanh.f32 %v322_v7  ;;  %v278_v14 = vmul.f32 %v262_v8, %v990_v2  ;;  %v1002_v15 = vadd.f32 %v662_v11, %v976_v46  ;;  %v192_v16 = vpop.f32.mrb[7].mxu0  ;;  %v308_v17 = vadd.f32 %v292_v9, %v981_v55 }
  0xed   :  { %v277_v18 = vmul.f32 %v261_v10, %v994_v5  ;;  %v1007_v19 = vadd.f32 %v976_v46, %v192_v16  ;;  %789 = vtanh.f32 %v321_v12  ;;  %v307_v20 = vadd.f32 %v291_v13, %v984_v58 }
  0xee   :  { %v264_v21 = vmul.f32 0.044715, %v1002_v15  ;;  %v324_v22 = vmul.f32 0.7978846, %v308_v17  ;;  %v294_v23 = vmul.f32 %v278_v14, %v990_v2 }
  0xef   :  { %v665_v24 = vpop.f32.mrb[8].mxu0  ;;  %v323_v25 = vmul.f32 0.7978846, %v307_v20  ;;  %v293_v26 = vmul.f32 %v277_v18, %v994_v5  ;;  %v263_v27 = vmul.f32 0.044715, %v1007_v19 }
  0xf0   :  { %v280_v28 = vmul.f32 %v264_v21, %v1002_v15  ;;  %v1016_v29 = vadd.f32 %v665_v24, %v976_v46  ;;  %v202_v30 = vpop.f32.mrb[9].mxu0  ;;  %791 = vtanh.f32 %v324_v22  ;;  %v310_v31 = vadd.f32 %v294_v23, %v990_v2 }
  0xf1   :  { %v1020_v32 = vadd.f32 %v976_v46, %v202_v30  ;;  %793 = vtanh.f32 %v323_v25  ;;  %v309_v33 = vadd.f32 %v293_v26, %v994_v5  ;;  %v279_v34 = vmul.f32 %v263_v27, %v1007_v19 }
  0xf2   :  { %v266_v36 = vmul.f32 0.044715, %v1016_v29  ;;  %v326_v37 = vmul.f32 0.7978846, %v310_v31  ;;  %v296_v38 = vmul.f32 %v280_v28, %v1002_v15 }
  0xf3   :  { %v265_v39 = vmul.f32 0.044715, %v1020_v32  ;;  %v668_v40 = vpop.f32.mrb[10].mxu0  ;;  %v325_v42 = vmul.f32 0.7978846, %v309_v33  ;;  %v295_v43 = vmul.f32 %v279_v34, %v1007_v19 }
  0xf4   :  { %v282_v44 = vmul.f32 %v266_v36, %v1016_v29  ;;  %v1030_v45 = vadd.f32 %v668_v40, %v976_v46  ;;  %v212_v47 = vpop.f32.mrb[11].mxu0  ;;  %795 = vtanh.f32 %v326_v37  ;;  %v312_v48 = vadd.f32 %v296_v38, %v1002_v15 }
  0xf5   :  { %v281_v49 = vmul.f32 %v265_v39, %v1020_v32  ;;  %v1035_v51 = vadd.f32 %v976_v46, %v212_v47  ;;  %797 = vtanh.f32 %v325_v42  ;;  %v311_v50 = vadd.f32 %v295_v43, %v1007_v19 }
  0xf6   :  { %v788_v52 = vpop.eup %787  ;;  %v268_v53 = vmul.f32 0.044715, %v1030_v45  ;;  %v328_v56 = vmul.f32 0.7978846, %v312_v48  ;;  %v298_v57 = vmul.f32 %v282_v44, %v1016_v29 }
  0xf7   :  { %v790_v59 = vpop.eup %789  ;;  %v267_v60 = vmul.f32 0.044715, %v1035_v51  ;;  %v671_v61 = vpop.f32.mrb[12].mxu0  ;;  %v354_v62 = vadd.f32 1.0, %v788_v52  ;;  %v327_v63 = vmul.f32 0.7978846, %v311_v50  ;;  %v297_v0 = vmul.f32 %v281_v49, %v1020_v32 }
  0xf8   :  { %v1044_v1 = vadd.f32 %v671_v61, %v976_v46  ;;  %v222_v3 = vpop.f32.mrb[13].mxu0  ;;  %v353_v4 = vadd.f32 1.0, %v790_v59  ;;  %799 = vtanh.f32 %v328_v56  ;;  %v284_v55 = vmul.f32 %v268_v53, %v1030_v45 }
  0xf9   :  { %v283_v7 = vmul.f32 %v267_v60, %v1035_v51  ;;  %v1050_v8 = vadd.f32 %v976_v46, %v222_v3  ;;  %801 = vtanh.f32 %v327_v63  ;;  %v313_v12 = vadd.f32 %v297_v0, %v1020_v32 }
  0xfa   :  { %v792_v9 = vpop.eup %791  ;;  %v270_v10 = vmul.f32 0.044715, %v1044_v1  ;;  %v369_v11 = vmul.f32 %v353_v4, %v241_v41  ;;  %v314_v13 = vadd.f32 %v298_v57, %v1016_v29  ;;  %v370_v17 = vmul.f32 %v354_v62, %v242_v35 }
  0xfb   :  { %v794_v14 = vpop.eup %793  ;;  %v269_v58 = vmul.f32 0.044715, %v1050_v8  ;;  %v674_v16 = vpop.f32.mrb[14].mxu0  ;;  %v356_v18 = vadd.f32 1.0, %v792_v9  ;;  %v299_v20 = vmul.f32 %v283_v7, %v1035_v51  ;;  %v329_v25 = vmul.f32 0.7978846, %v313_v12 }
  0xfc   :  { %v286_v21 = vmul.f32 %v270_v10, %v1044_v1  ;;  %v1059_v22 = vadd.f32 %v674_v16, %v976_v46  ;;  %v232_v23 = vpop.f32.mrb[15].mxu0  ;;  %707 = vmatprep.mubr.f32.mxu0 %v369_v11  ;;  %v355_v24 = vadd.f32 1.0, %v794_v14  ;;  %v330_v30 = vmul.f32 0.7978846, %v314_v13 }
  0xfd   :  { %v285_v26 = vmul.f32 %v269_v58, %v1050_v8  ;;  %v1063_v27 = vadd.f32 %v976_v46, %v232_v23  ;;  %708 = vmatmul.mubr.f32.vlgmr.msra.gmra.mrb[16].mxu0 %v370_v17  ;;  %v372_v28 = vmul.f32 %v356_v18, %v244_v54  ;;  %803 = vtanh.f32 %v329_v25 }
  0xfe   :  { %v796_v31 = vpop.eup %795  ;;  %v272_v33 = vmul.f32 0.044715, %v1059_v22  ;;  %v371_v34 = vmul.f32 %v355_v24, %v243_v6  ;;  %v315_v35 = vadd.f32 %v299_v20, %v1035_v51  ;;  %805 = vtanh.f32 %v330_v30 }
  0xff   :  { %v798_v36 = vpop.eup %797  ;;  %v271_v37 = vmul.f32 0.044715, %v1063_v27  ;;  %v358_v38 = vadd.f32 1.0, %v796_v31  ;;  %v300_v39 = vmul.f32 %v284_v55, %v1030_v45  ;;  %v245_v46 = vmul.f32 0.5, %v994_v5 }
 0x100   :  { %710 = vmatprep.mubr.f32.mxu0 %v371_v34  ;;  %v357_v40 = vadd.f32 1.0, %v798_v36  ;;  %v246_v41 = vmul.f32 0.5, %v990_v2  ;;  %v331_v42 = vmul.f32 0.7978846, %v315_v35  ;;  %v288_v43 = vmul.f32 %v272_v33, %v1059_v22 }
 0x101   :  { %v287_v44 = vmul.f32 %v271_v37, %v1063_v27  ;;  %711 = vmatmul.mubr.f32.gmra.mrb[18].mxu0 %v372_v28  ;;  %v316_v47 = vadd.f32 %v300_v39, %v1030_v45  ;;  %v301_v48 = vmul.f32 %v285_v26, %v1050_v8  ;;  %v302_v52 = vmul.f32 %v286_v21, %v1044_v1 }
 0x102   :  { %v800_v49 = vpop.eup %799  ;;  %v373_v50 = vmul.f32 %v357_v40, %v245_v46  ;;  %807 = vtanh.f32 %v331_v42  ;;  %v374_v5 = vmul.f32 %v358_v38, %v246_v41  ;;  %v247_v57 = vmul.f32 0.5, %v1007_v19  ;;  %v590_v40 = vld [vmem:[%s1163_s4] ss:$0 sm:$0xff] }
 0x103   :  { %v802_v53 = vpop.eup %801  ;;  %v360_v54 = vadd.f32 1.0, %v800_v49  ;;  %v332_v56 = vmul.f32 0.7978846, %v316_v47  ;;  %v317_v2 = vadd.f32 %v301_v48, %v1050_v8  ;;  %v318_v60 = vadd.f32 %v302_v52, %v1044_v1 }
 0x104   :  { %713 = vmatprep.mubr.f32.mxu0 %v373_v50  ;;  %v359_v59 = vadd.f32 1.0, %v802_v53  ;;  %v303_v61 = vmul.f32 %v287_v44, %v1063_v27  ;;  %v248_v62 = vmul.f32 0.5, %v1002_v15  ;;  %v304_v0 = vmul.f32 %v288_v43, %v1059_v22 }
 0x105   :  { %714 = vmatmul.mubr.f32.gmra.mrb[20].mxu0 %v374_v5  ;;  %809 = vtanh.f32 %v332_v56  ;;  %v333_v63 = vmul.f32 0.7978846, %v317_v2  ;;  %v334_v4 = vmul.f32 0.7978846, %v318_v60  ;;  %v249_v15 = vmul.f32 0.5, %v1020_v32 }
 0x106   :  { %v375_v3 = vmul.f32 %v359_v59, %v247_v57  ;;  %v319_v6 = vadd.f32 %v303_v61, %v1063_v27  ;;  %v376_v55 = vmul.f32 %v360_v54, %v248_v62  ;;  %v320_v19 = vadd.f32 %v304_v0, %v1059_v22 }
 0x107   :  { %811 = vtanh.f32 %v333_v63  ;;  %v804_v7 = vpop.eup %803  ;;  %v250_v13 = vmul.f32 0.5, %v1016_v29  ;;  %v251_v18 = vmul.f32 0.5, %v1035_v51  ;;  %v252_v24 = vmul.f32 0.5, %v1030_v45 }
 0x108   :  { %716 = vmatprep.mubr.f32.mxu1 %v375_v3  ;;  %813 = vtanh.f32 %v334_v4  ;;  %v335_v9 = vmul.f32 0.7978846, %v319_v6  ;;  %v806_v10 = vpop.eup %805  ;;  %v361_v11 = vadd.f32 1.0, %v804_v7  ;;  %v336_v12 = vmul.f32 0.7978846, %v320_v19 }
 0x109   :  { %717 = vmatmul.mubr.f32.vlgmr.msra.gmra.mrb[0].mxu1 %v376_v55  ;;  %v362_v14 = vadd.f32 1.0, %v806_v10  ;;  %v253_v28 = vmul.f32 0.5, %v1050_v8  ;;  %v254_v51 = vmul.f32 0.5, %v1044_v1  ;;  %v255_v36 = vmul.f32 0.5, %v1063_v27 }
 0x10a   :  { %815 = vtanh.f32 %v335_v9  ;;  %v377_v58 = vmul.f32 %v361_v11, %v249_v15  ;;  %v256_v46 = vmul.f32 0.5, %v1059_v22 }
 0x10b   :  { %817 = vtanh.f32 %v336_v12  ;;  %v378_v17 = vmul.f32 %v362_v14, %v250_v13 }
 0x10c   :  { %v808_v16 = vpop.eup %807  ;;  %719 = vmatprep.mubr.f32.mxu1 %v377_v58 }
 0x10d   :  { %v363_v20 = vadd.f32 1.0, %v808_v16  ;;  %720 = vmatmul.mubr.f32.gmra.mrb[2].mxu1 %v378_v17 }
 0x10f   :  { %v810_v21 = vpop.eup %809  ;;  %v379_v23 = vmul.f32 %v363_v20, %v251_v18 }
 0x110   :  { %v364_v32 = vadd.f32 1.0, %v810_v21 }
 0x111   :  { %v812_v25 = vpop.eup %811  ;;  %722 = vmatprep.mubr.f32.mxu1 %v379_v23 }
 0x112   :  { %v814_v26 = vpop.eup %813  ;;  %v380_v29 = vmul.f32 %v364_v32, %v252_v24  ;;  %v365_v30 = vadd.f32 1.0, %v812_v25 }
 0x113   :  { %v366_v31 = vadd.f32 1.0, %v814_v26 }
 0x114   :  { %v816_v33 = vpop.eup %815  ;;  %723 = vmatmul.mubr.f32.gmra.mrb[4].mxu1 %v380_v29  ;;  %v381_v34 = vmul.f32 %v365_v30, %v253_v28 }
 0x115   :  { %v818_v35 = vpop.eup %817  ;;  %v367_v37 = vadd.f32 1.0, %v816_v33  ;;  %v382_v45 = vmul.f32 %v366_v31, %v254_v51 }
 0x116   :  { %725 = vmatprep.mubr.f32.mxu1 %v381_v34  ;;  %v368_v38 = vadd.f32 1.0, %v818_v35 }
 0x117   :  { %v383_v39 = vmul.f32 %v367_v37, %v255_v36 }
 0x118   :  { %726 = vmatmul.mubr.f32.gmra.mrb[6].mxu1 %v382_v45  ;;  %v384_v8 = vmul.f32 %v368_v38, %v256_v46 }
 0x119   :  { %728 = vmatprep.mubr.f32.mxu1 %v383_v39 }
 0x11c   :  { %729 = vmatmul.mubr.f32.gmra.mrb[8].mxu1 %v384_v8 }
 0x1d0   :  { %v709_v41 = vpop.f32.mrb[16].mxu0 }
 0x1d1   :  { %v480_v1 = vadd.f32 %v709_v41, %v590_v40  ;;  %v474_v42 = vpop.f32.mrb[17].mxu0 }
 0x1d2   :  { %v475_v43 = vadd.f32 %v590_v40, %v474_v42 }
 0x1d3   :  { %554 = vst.msk [vmem:[%s1164_s5 + $0x8] sm:$0xff] %vm47_vm0, %v480_v1 }
 0x1d4   :  { %553 = vst.msk [vmem:[%s1164_s5] sm:$0xff] %vm47_vm0, %v475_v43  ;;  %v712_v22 = vpop.f32.mrb[18].mxu0 }
 0x1d5   :  { %v490_v27 = vadd.f32 %v712_v22, %v590_v40  ;;  %v484_v44 = vpop.f32.mrb[19].mxu0 }
 0x1d6   :  { %v485_v47 = vadd.f32 %v590_v40, %v484_v44 }
 0x1d7   :  { %556 = vst.msk [vmem:[%s1164_s5 + $0x18] sm:$0xff] %vm47_vm0, %v490_v27 }
 0x1d8   :  { %555 = vst.msk [vmem:[%s1164_s5 + $0x10] sm:$0xff] %vm47_vm0, %v485_v47  ;;  %v715_v48 = vpop.f32.mrb[20].mxu0 }
 0x1d9   :  { %v500_v49 = vadd.f32 %v715_v48, %v590_v40  ;;  %v494_v50 = vpop.f32.mrb[21].mxu0 }
 0x1da   :  { %v495_v52 = vadd.f32 %v590_v40, %v494_v50 }
 0x1db   :  { %558 = vst.msk [vmem:[%s1164_s5 + $0x28] sm:$0xff] %vm47_vm0, %v500_v49 }
 0x1dc   :  { %557 = vst.msk [vmem:[%s1164_s5 + $0x20] sm:$0xff] %vm47_vm0, %v495_v52  ;;  %v718_v53 = vpop.f32.mrb[0].mxu1 }
 0x1dd   :  { %v510_v5 = vadd.f32 %v718_v53, %v590_v40  ;;  %v504_v54 = vpop.f32.mrb[1].mxu1 }
 0x1de   :  { %v505_v56 = vadd.f32 %v590_v40, %v504_v54 }
 0x1df   :  { %560 = vst.msk [vmem:[%s1164_s5 + $0x38] sm:$0xff] %vm47_vm0, %v510_v5 }
 0x1e0   :  { %559 = vst.msk [vmem:[%s1164_s5 + $0x30] sm:$0xff] %vm47_vm0, %v505_v56  ;;  %v721_v2 = vpop.f32.mrb[2].mxu1 }
 0x1e1   :  { %v520_v57 = vadd.f32 %v721_v2, %v590_v40  ;;  %v514_v59 = vpop.f32.mrb[3].mxu1 }
 0x1e2   :  { %v515_v60 = vadd.f32 %v590_v40, %v514_v59 }
 0x1e3   :  { %562 = vst.msk [vmem:[%s1164_s5 + $0x48] sm:$0xff] %vm47_vm0, %v520_v57 }
 0x1e4   :  { %561 = vst.msk [vmem:[%s1164_s5 + $0x40] sm:$0xff] %vm47_vm0, %v515_v60 }
 0x1e7   :  { %v724_v61 = vpop.f32.mrb[4].mxu1 }
 0x1e8   :  { %v530_v62 = vadd.f32 %v724_v61, %v590_v40  ;;  %v524_v63 = vpop.f32.mrb[5].mxu1 }
 0x1e9   :  { %v525_v0 = vadd.f32 %v590_v40, %v524_v63 }
 0x1ea   :  { %564 = vst.msk [vmem:[%s1164_s5 + $0x58] sm:$0xff] %vm47_vm0, %v530_v62 }
 0x1eb   :  { %563 = vst.msk [vmem:[%s1164_s5 + $0x50] sm:$0xff] %vm47_vm0, %v525_v0  ;;  %v727_v3 = vpop.f32.mrb[6].mxu1 }
 0x1ec   :  { %v540_v4 = vadd.f32 %v727_v3, %v590_v40  ;;  %v534_v6 = vpop.f32.mrb[7].mxu1 }
 0x1ed   :  { %v535_v55 = vadd.f32 %v590_v40, %v534_v6 }
 0x1ee   :  { %566 = vst.msk [vmem:[%s1164_s5 + $0x68] sm:$0xff] %vm47_vm0, %v540_v4 }
 0x1ef   :  { %565 = vst.msk [vmem:[%s1164_s5 + $0x60] sm:$0xff] %vm47_vm0, %v535_v55  ;;  %v730_v19 = vpop.f32.mrb[8].mxu1 }
 0x1f0   :  { %v550_v7 = vadd.f32 %v730_v19, %v590_v40  ;;  %v544_v9 = vpop.f32.mrb[9].mxu1 }
 0x1f1   :  { %v545_v10 = vadd.f32 %v590_v40, %v544_v9 }
 0x1f2   :  { %568 = vst.msk [vmem:[%s1164_s5 + $0x78] sm:$0xff] %vm47_vm0, %v550_v7 }
 0x1f3   :  { %567 = vst.msk [vmem:[%s1164_s5 + $0x70] sm:$0xff] %vm47_vm0, %v545_v10 }

</bundles_post_ra>
